<compile_context>
chip_gen: v7x
topology: tpu7x:2x2x1
jax: 0.10.0
libtpu: 0.0.40
codegen_flags: <defaults>
</compile_context>

<pallas_src>
import jax
import jax.numpy as jnp
from jax import lax
from jax.experimental import pallas as pl
from jax.experimental.pallas import tpu as pltpu


def _skip_linear_kernel(x_ref, w_ref, b_ref, o_ref):
    # x_ref: (tm, D_in) tile, w_ref: (D_out, D_in) PyTorch layout, b_ref: (1, D_out)
    x = x_ref[...]
    # y = x @ W^T computed directly on the MXU: contract x dim 1 with w dim 1.
    y = lax.dot_general(
        x, w_ref[...],
        dimension_numbers=(((1,), (1,)), ((), ())),
        preferred_element_type=jnp.float32,
    )
    # Fused residual + bias add (VPU) in f32, then cast to output dtype.
    o_ref[...] = (x.astype(jnp.float32) + y + b_ref[...].astype(jnp.float32)).astype(o_ref.dtype)


def _round_up(x, m):
    return (x + m - 1) // m * m


def skip_connection_linear(x, weight, bias, *, max_tm=512):
    """out[M, D] = x + x @ weight.T + bias, fully inside one Pallas kernel.

    x: (M, D); weight: (D, D) in PyTorch (out, in) layout; bias: (D,).
    """
    M, D = x.shape

    # Large row tile (up to 512) to amortize per-step pipeline overhead and keep
    # the kernel at the HBM roofline; capped by M (rounded to the 8-sublane min).
    tm = min(max_tm, _round_up(M, 8))
    Mp = _round_up(M, tm)
    if Mp != M:
        x = jnp.pad(x, ((0, Mp - M), (0, 0)))

    b2 = bias.reshape(1, D)

    cost = pl.CostEstimate(
        flops=2 * Mp * D * D + Mp * D,
        transcendentals=0,
        bytes_accessed=(2 * Mp * D + D * D + D) * x.dtype.itemsize,
    )

    # TODO(synk): for D >~ 2048 the resident (D, D) f32 weight block no longer
    # fits scoped VMEM; add tn/tk grid axes with a VMEM f32 accumulator and
    # pl.when init/finalize instead of keeping the whole weight resident.
    out = pl.pallas_call(
        _skip_linear_kernel,
        out_shape=jax.ShapeDtypeStruct((Mp, D), x.dtype),
        grid_spec=pltpu.PrefetchScalarGridSpec(
            num_scalar_prefetch=0,
            grid=(Mp // tm,),
            in_specs=[
                pl.BlockSpec((tm, D), lambda i: (i, 0)),   # activation row tile
                pl.BlockSpec((D, D), lambda i: (0, 0)),    # weight, VMEM-resident
                pl.BlockSpec((1, D), lambda i: (0, 0)),    # bias
            ],
            out_specs=pl.BlockSpec((tm, D), lambda i: (i, 0)),
        ),
        compiler_params=pltpu.CompilerParams(
            dimension_semantics=("parallel",),
        ),
        cost_estimate=cost,
    )(x, weight, b2)

    if Mp != M:
        out = out[:M]
    return out


def skip_connection_forward(x_bnd, weight, bias):
    """SkipConnection(nn.Linear(D, D)).forward(x) for x of shape (B, N, D).

    weight: (D_out, D_in) PyTorch convention; bias: (D_out,).
    """
    B, N, D = x_bnd.shape
    x2 = x_bnd.reshape(B * N, D)
    out2 = skip_connection_linear(x2, weight, bias)
    return out2.reshape(B, N, D)


if __name__ == "__main__":
    B, N, D = 2, 8, 128   # small demo shapes; M = B*N = 16 rows, D = 128 lanes

    key = jax.random.PRNGKey(0)
    kx, kw, kb = jax.random.split(key, 3)

    x = jax.random.normal(kx, (B, N, D), dtype=jnp.float32)
    # deterministic "Linear" params (PyTorch-style uniform(-1/sqrt(D), 1/sqrt(D)))
    bound = 1.0 / (D ** 0.5)
    weight = jax.random.uniform(kw, (D, D), minval=-bound, maxval=bound, dtype=jnp.float32)
    bias = jax.random.uniform(kb, (D,), minval=-bound, maxval=bound, dtype=jnp.float32)

    out = skip_connection_forward(x, weight, bias)
    out = jax.block_until_ready(out)

    # reference: x + Linear(x)  (Linear(x) = x @ W^T + b)
    ref = x + (jnp.einsum("bnd,od->bno", x, weight) + bias)
    assert out.shape == ref.shape
    assert jnp.allclose(out, ref, atol=1e-4, rtol=1e-4), "mismatch vs reference"

    print("KERNEL_OK")
</pallas_src>

<mosaic_0001>
module attributes {stable_mosaic.version = 11 : i64} {
  func.func @_skip_linear_kernel(%arg0: i32, %arg1: memref<16x128xf32, #tpu.memory_space<vmem>>, %arg2: memref<128x128xf32, #tpu.memory_space<vmem>>, %arg3: memref<1x128xf32, #tpu.memory_space<vmem>>, %arg4: memref<16x128xf32, #tpu.memory_space<vmem>>) attributes {dimension_semantics = [#tpu.dimension_semantics<parallel>], iteration_bounds = array<i64: 1>, scalar_prefetch = 0 : i64, scratch_operands = 0 : i64, tpu.core_type = #tpu.core_type<tc>, window_params = [{transform_indices = @transform_0, window_bounds = array<i64: 16, 128>}, {pipeline_mode = #tpu.pipeline_mode<synchronous>, transform_indices = @transform_1, window_bounds = array<i64: 128, 128>}, {pipeline_mode = #tpu.pipeline_mode<synchronous>, transform_indices = @transform_2, window_bounds = array<i64: 1, 128>}, {transform_indices = @transform_3, window_bounds = array<i64: 16, 128>}]} {
    %c0 = arith.constant 0 : index
    %c0_0 = arith.constant 0 : index
    %0 = vector.load %arg1[%c0, %c0_0] : memref<16x128xf32, #tpu.memory_space<vmem>>, vector<16x128xf32>
    %c0_1 = arith.constant 0 : index
    %c0_2 = arith.constant 0 : index
    %1 = vector.load %arg2[%c0_1, %c0_2] : memref<128x128xf32, #tpu.memory_space<vmem>>, vector<128x128xf32>
    %cst = arith.constant dense<0.000000e+00> : vector<16x128xf32>
    %2 = tpu.matmul %0, %1, %cst {dimension_numbers = #tpu.dot_dimension_numbers<[1], [1], [0], [0], [0, 0, 1, 0], [], []>} : vector<16x128xf32>, vector<128x128xf32>, vector<16x128xf32> -> vector<16x128xf32>
    %3 = arith.addf %0, %2 : vector<16x128xf32>
    %c0_3 = arith.constant 0 : index
    %c0_4 = arith.constant 0 : index
    %4 = vector.load %arg3[%c0_3, %c0_4] : memref<1x128xf32, #tpu.memory_space<vmem>>, vector<1x128xf32>
    %5 = vector.broadcast %4 : vector<1x128xf32> to vector<16x128xf32>
    %6 = arith.addf %3, %5 : vector<16x128xf32>
    %c0_5 = arith.constant 0 : index
    %c0_6 = arith.constant 0 : index
    %7 = vector.load %arg4[%c0_5, %c0_6] : memref<16x128xf32, #tpu.memory_space<vmem>>, vector<16x128xf32>
    tpu.vector_store %arg4[%c0_5, %c0_6], %6 {strides = array<i32>} : memref<16x128xf32, #tpu.memory_space<vmem>>, vector<16x128xf32>,
    return
  }
  func.func @transform_0(%arg0: i32) -> (i32, i32) {
    %c0_i32 = arith.constant 0 : i32
    %c0_i32_0 = arith.constant 0 : i32
    return %arg0, %c0_i32 : i32, i32
  }
  func.func @transform_1(%arg0: i32) -> (i32, i32) {
    %c0_i32 = arith.constant 0 : i32
    %c0_i32_0 = arith.constant 0 : i32
    %c0_i32_1 = arith.constant 0 : i32
    return %c0_i32, %c0_i32_0 : i32, i32
  }
  func.func @transform_2(%arg0: i32) -> (i32, i32) {
    %c0_i32 = arith.constant 0 : i32
    %c0_i32_0 = arith.constant 0 : i32
    %c0_i32_1 = arith.constant 0 : i32
    return %c0_i32, %c0_i32_0 : i32, i32
  }
  func.func @transform_3(%arg0: i32) -> (i32, i32) {
    %c0_i32 = arith.constant 0 : i32
    %c0_i32_0 = arith.constant 0 : i32
    return %arg0, %c0_i32 : i32, i32
  }
}

</mosaic_0001>

<bundles_post_ra>
// kernel: tpu_custom_call.1
= control target key start
LH: loop header
LB: loop body
LE: loop exit
PB: predicated region body
PF: predicated region fallthrough
CT: control target
= control target key end

     0   :  { %8 = vsyncpa [#allocation3], 0  ;;  %s403_s0 = inlined_call_operand.hbm [shape: f32[16,128], index: 0, kind: input, shape index: {}]   ;;  %s404_s1 = inlined_call_operand.hbm [shape: f32[128,128], index: 1, kind: input, shape index: {}]   ;;  %s405_s2 = inlined_call_operand.vmem [shape: f32[1,128], index: 2, kind: input, shape index: {}]   ;;  %s406_s3 = inlined_call_operand.hbm [shape: f32[16,128], index: 3, kind: output, shape index: {}]  }
   0x1   :  { %9 = vsyncpa [#allocation6], 0 }
   0x2   :  { %10 = vsyncpa [#allocation4], 0  ;;  %s330_s12 = smov [#allocation2]   ;;  %s258_s16 = scalar_lea.hbm %s403_s0, 256 }
   0x3   :  { %s16_s13 = sshll.u32 %s330_s12, 4  ;;  %p259_p0 = scmp.ne.s32.totalorder %s403_s0, %s258_s16  ;;  %s17_s13 = int_to_ptr.vmem [resolvable:$true] %s16_s13 }
   0x4   :  { %p262_p1 = scmp.lt.u32.totalorder %s258_s16, %s403_s0 }
   0x6   :  { %p264_p2 = pnand %p262_p1, %p259_p0 }
   0x8   :  { %267 = shalt.err (!%p264_p2)
}
   0x9   :  { %s268_s21 = scalar_lea.vmem %s17_s13, 256  ;;  %p273_p4 = scmp.lt.s32.totalorder %s17_s13, %s17_s13 }
   0xa   :  { %p269_p3 = scmp.ne.s32.totalorder %s17_s13, %s268_s21  ;;  %p274_p5 = scmp.lt.s32.totalorder %s268_s21, %s268_s21 }
   0xc   :  { %p275_p6 = por %p274_p5, %p273_p4 }
   0xe   :  { %p276_p7 = pnand %p275_p6, %p269_p3 }
  0x10   :  { %279 = shalt.err (!%p276_p7)
}
  0x11   :  { %s331_s22 = smov 128   ;;  %s332_s23 = smov 8  }
  0x12   :  { %22 = dma.hbm_to_vmem [thread:$0]  %s403_s0, 256, %s17_s13, [#allocation3], %s331_s22, %s331_s22, %s332_s23  }
  0x13   :  { %s333_s26 = smov [#allocation5]   ;;  %s280_s30 = scalar_lea.hbm %s404_s1, 2048 }
  0x14   :  { %s28_s27 = sshll.u32 %s333_s26, 4  ;;  %p281_p8 = scmp.ne.s32.totalorder %s404_s1, %s280_s30  ;;  %s29_s27 = int_to_ptr.vmem [resolvable:$true] %s28_s27 }
  0x15   :  { %p284_p9 = scmp.lt.u32.totalorder %s280_s30, %s404_s1 }
  0x17   :  { %p286_p10 = pnand %p284_p9, %p281_p8 }
  0x19   :  { %289 = shalt.err (!%p286_p10)
}
  0x1a   :  { %s290_s8 = scalar_lea.vmem %s29_s27, 2048  ;;  %p295_p12 = scmp.lt.s32.totalorder %s29_s27, %s29_s27 }
  0x1b   :  { %p291_p11 = scmp.ne.s32.totalorder %s29_s27, %s290_s8  ;;  %p296_p13 = scmp.lt.s32.totalorder %s290_s8, %s290_s8 }
  0x1d   :  { %p297_p0 = por %p296_p13, %p295_p12 }
  0x1f   :  { %p298_p1 = pnand %p297_p0, %p291_p11 }
  0x21   :  { %301 = shalt.err (!%p298_p1)
}
  0x22   :  { %34 = dma.hbm_to_vmem [thread:$0]  %s404_s1, 2048, %s29_s27, [#allocation6], %s331_s22, %s331_s22, %s332_s23  }
  0x23   :  { %324 = dma.done.wait [#allocation3], 256  }
  0x24   :  { %325 = vsyncadd [#allocation3], 4294967040 }
  0x25   :  { %326 = dma.done.wait [#allocation6], 2048  }
  0x26   :  { %327 = vsyncadd [#allocation6], 4294965248  ;;  %v45_v0 = vld [vmem:[#allocation5] sm:$0xff]  ;;  %v46_v1 = vld [vmem:[#allocation5 + $0x8] sm:$0xff]  ;;  %s334_s11 = smov [#allocation7]  }
  0x27   :  { %v47_v2 = vld [vmem:[#allocation5 + $0x10] sm:$0xff]  ;;  %v221_v3 = vpack.c.bf16 %v46_v1, %v45_v0  ;;  %v48_v4 = vld [vmem:[#allocation5 + $0x18] sm:$0xff]  ;;  %v49_v7 = vld [vmem:[#allocation5 + $0x20] sm:$0xff]  ;;  %s154_s12 = sshll.u32 %s334_s11, 4  ;;  %s155_s12 = int_to_ptr.vmem [resolvable:$true] %s154_s12 }
  0x28   :  { %v225_v5 = vpack.c.bf16 %v48_v4, %v47_v2  ;;  %v43_v6 = vld [vmem:[#allocation2] sm:$0xff]  ;;  %v50_v8 = vld [vmem:[#allocation5 + $0x28] sm:$0xff]  ;;  %v52_v11 = vld [vmem:[#allocation5 + $0x38] sm:$0xff]  ;;  %s302_s13 = scalar_lea.vmem %s155_s12, 256  ;;  %p307_p3 = scmp.lt.s32.totalorder %s155_s12, %s155_s12 }
  0x29   :  { %222 = vmatprep.subr.bf16.mxu0 %v221_v3  ;;  %218 = vmatprep.mubr.f32.mxu0 %v43_v6  ;;  %v229_v9 = vpack.c.bf16 %v50_v8, %v49_v7  ;;  %v51_v10 = vld [vmem:[#allocation5 + $0x30] sm:$0xff]  ;;  %v53_v13 = vld [vmem:[#allocation5 + $0x40] sm:$0xff]  ;;  %v54_v14 = vld [vmem:[#allocation5 + $0x48] sm:$0xff]  ;;  %p303_p2 = scmp.ne.s32.totalorder %s155_s12, %s302_s13  ;;  %p308_p4 = scmp.lt.s32.totalorder %s302_s13, %s302_s13 }
  0x2a   :  { %224 = vmatpush3.bf16.xpose.msra.mxu0 %v221_v3  ;;  %v233_v12 = vpack.c.bf16 %v52_v11, %v51_v10  ;;  %v237_v15 = vpack.c.bf16 %v54_v14, %v53_v13  ;;  %v55_v16 = vld [vmem:[#allocation5 + $0x50] sm:$0xff]  ;;  %v56_v17 = vld [vmem:[#allocation5 + $0x58] sm:$0xff]  ;;  %v57_v19 = vld [vmem:[#allocation5 + $0x60] sm:$0xff] }
  0x2b   :  { %226 = vmatprep.subr.bf16.mxu0 %v225_v5  ;;  %v241_v18 = vpack.c.bf16 %v56_v17, %v55_v16  ;;  %v58_v20 = vld [vmem:[#allocation5 + $0x68] sm:$0xff]  ;;  %v59_v22 = vld [vmem:[#allocation5 + $0x70] sm:$0xff]  ;;  %v60_v23 = vld [vmem:[#allocation5 + $0x78] sm:$0xff]  ;;  %p309_p5 = por %p308_p4, %p307_p3 }
  0x2c   :  { %v245_v21 = vpack.c.bf16 %v58_v20, %v57_v19  ;;  %v249_v24 = vpack.c.bf16 %v60_v23, %v59_v22  ;;  %v44_v25 = vld [vmem:[#allocation2 + $0x8] sm:$0xff]  ;;  %v167_v27 = vld [vmem:[%s405_s2] ss:$0 sm:$0xff] }
  0x2d   :  { %p310_p6 = pnand %p309_p5, %p303_p2 }
  0x32   :  { %228 = vmatpush3.bf16.xpose.msra.mxu0 %v225_v5 }
  0x33   :  { %230 = vmatprep.subr.bf16.mxu0 %v229_v9 }
  0x3a   :  { %232 = vmatpush3.bf16.xpose.msra.mxu0 %v229_v9 }
  0x3b   :  { %234 = vmatprep.subr.bf16.mxu0 %v233_v12 }
  0x42   :  { %236 = vmatpush3.bf16.xpose.msra.mxu0 %v233_v12 }
  0x43   :  { %238 = vmatprep.subr.bf16.mxu0 %v237_v15 }
  0x4a   :  { %240 = vmatpush3.bf16.xpose.msra.mxu0 %v237_v15 }
  0x4b   :  { %242 = vmatprep.subr.bf16.mxu0 %v241_v18 }
  0x52   :  { %244 = vmatpush3.bf16.xpose.msra.mxu0 %v241_v18 }
  0x53   :  { %246 = vmatprep.subr.bf16.mxu0 %v245_v21 }
  0x5a   :  { %248 = vmatpush3.bf16.xpose.msra.mxu0 %v245_v21 }
  0x5b   :  { %250 = vmatprep.subr.bf16.mxu0 %v249_v24 }
  0x62   :  { %252 = vmatpush3.bf16.xpose.msra.mxu0 %v249_v24 }
  0x69   :  { %219 = vmatmul.mubr.f32.vlgmr.msra.gmra.mrb[0].mxu0 %v44_v25 }
 0x13c   :  { %v220_v26 = vpop.f32.mrb[0].mxu0 }
 0x13d   :  { %v137_v28 = vadd.f32 %v220_v26, %v44_v25  ;;  %v127_v29 = vpop.f32.mrb[1].mxu0 }
 0x13e   :  { %v136_v30 = vadd.f32 %v127_v29, %v43_v6 }
 0x13f   :  { %v146_v31 = vadd.f32 %v167_v27, %v137_v28 }
 0x140   :  { %v145_v32 = vadd.f32 %v167_v27, %v136_v30 }
 0x141   :  { %148 = vst [vmem:[#allocation7 + $0x8] sm:$0xff] %v146_v31 }
 0x142   :  { %147 = vst [vmem:[#allocation7] sm:$0xff] %v145_v32 }
 0x143   :  { %313 = shalt.err (!%p310_p6)
}
 0x144   :  { %s314_s2 = scalar_lea.hbm %s406_s3, 256 }
 0x145   :  { %p315_p7 = scmp.ne.s32.totalorder %s406_s3, %s314_s2  ;;  %p318_p8 = scmp.lt.u32.totalorder %s314_s2, %s406_s3 }
 0x147   :  { %p320_p9 = pnand %p318_p8, %p315_p7 }
 0x149   :  { %323 = shalt.err (!%p320_p9)
}
 0x14a   :  { %160 = dma.vmem_to_hbm [thread:$0]  %s155_s12, 256, %s406_s3, [#allocation4], %s331_s22, %s331_s22, %s332_s23  }
 0x14b   :  { %328 = dma.done.wait [#allocation4], 256  }
 0x14c   :  { %329 = vsyncadd [#allocation4], 4294967040 }
 0x14d   :  { %164 = vsyncpa [#allocation3], 1 }
 0x14e   :  { %165 = vsyncpa [#allocation6], 1 }
 0x14f   :  { %166 = vsyncpa [#allocation4], 1 }

</bundles_post_ra>
